<compile_context>
chip_gen: v6e
topology: v6e:2x2x1
jax: 0.10.0
libtpu: 0.0.40
codegen_flags: <defaults>
</compile_context>

<pallas_src>
import math

import jax
import jax.numpy as jnp
from jax.experimental import pallas as pl
from jax.experimental.pallas import tpu as pltpu

EPS = 1e-5
_LANES = 128
_MIN_PALLAS_BYTES = 1 << 20      # below this, a fused XLA multiply wins
_MAX_SLAB_BYTES = 128 << 10      # cap on the periodic lane-dense factor slab


def _vmem_budget():
    """Return (tile_target_bytes, vmem_limit_bytes), generation aware.

    Conservative default works on every generation (v7x has only 64 MiB VMEM);
    bump the tile on 128-MiB parts (v5e/v6e) where per-step overhead matters
    less but bigger tiles are free.
    """
    target, limit = 4 << 20, 32 << 20
    try:
        cap = pltpu.get_tpu_info().vmem_capacity_bytes
        if cap >= (100 << 20):           # v5e / v6e: 128 MiB physical VMEM
            target, limit = 8 << 20, 48 << 20
    except Exception:
        pass
    return target, limit


def _sublane_pack(dtype) -> int:
    """Rows per packed sublane tile: 8 for f32, 16 for bf16, 32 for int8/fp8."""
    return 8 * max(1, 4 // jnp.dtype(dtype).itemsize)


def _scale_kernel(x_ref, f_ref, y_ref):
    """y = x * factor.

    factor is either (1, tw) (plain broadcast over the row tile) or an
    (Lp, tw) periodic slab with the row tile a static multiple of Lp, in which
    case the tile is viewed as (tr//Lp, Lp, tw) so the slab broadcasts cleanly.
    """
    tr, tw = x_ref.shape
    lp = f_ref.shape[0]
    if lp == 1:
        y_ref[...] = x_ref[...] * f_ref[...]
    else:
        x = x_ref[...].reshape(tr // lp, lp, tw)
        y_ref[...] = (x * f_ref[...]).reshape(tr, tw)


def scaling_forward(x: jax.Array, scale: jax.Array, reverse: bool = False,
                    *, force_pallas: bool = False):
    """x: (B, D), scale: (1, D) -> (y: (B, D), det: scalar log-det)."""
    B, D = x.shape
    assert scale.shape == (1, D)

    # Log-det of the Jacobian: trivial D-length reduction -> plain XLA op.
    det = jnp.sum(scale)

    # Per-feature multiplicative factor, computed once in f32 on a (1, D) array.
    factor = jnp.exp(scale.astype(jnp.float32)) + EPS
    if reverse:
        factor = 1.0 / factor            # matches torch .reciprocal()
    # TODO(synk): for sub-f32 x (e.g. bf16) PyTorch would promote the multiply
    # to f32; we keep the multiply in x.dtype for bandwidth.
    factor = factor.astype(x.dtype)

    itemsize = jnp.dtype(x.dtype).itemsize

    # Tiny inputs: the pallas_call / DMA setup cost dominates -> fused XLA op.
    if (not force_pallas) and B * D * itemsize < _MIN_PALLAS_BYTES:
        return x * factor, det

    target, vmem_limit = _vmem_budget()
    sub = _sublane_pack(x.dtype)

    # ------------------------------------------------------------------
    # Lane-dense layout: whenever D is not already a multiple of 128 but the
    # flattened array packs into 128 lanes, flatten to (B*D/128, 128) and
    # build a small periodic factor slab of Lp rows (Lp = 1 when D | 128).
    # ------------------------------------------------------------------
    lane_dense = False
    Lp = 1
    if (D % _LANES != 0) and ((B * D) % _LANES == 0):
        L = D // math.gcd(D, _LANES)                      # row period of the pattern
        Lp_cand = 1 if L == 1 else (L * sub) // math.gcd(L, sub)
        R_flat = (B * D) // _LANES
        if Lp_cand * _LANES * itemsize <= _MAX_SLAB_BYTES and R_flat >= Lp_cand:
            lane_dense = True
            Lp = Lp_cand

    if lane_dense:
        R, W = (B * D) // _LANES, _LANES
        x_flat = x.reshape(R, W)
        reps = (Lp * _LANES) // D                         # integer by construction
        factor_flat = jnp.tile(factor, (1, reps)).reshape(Lp, _LANES)
    else:
        R, W = B, D
        x_flat = x
        factor_flat = factor                              # (1, D)

    # ------------------------------------------------------------------
    # Tile sizing: column tile only for extremely wide rows, otherwise full
    # width; row tile ~ the VMEM target, rounded to the dtype pack / period.
    # ------------------------------------------------------------------
    if W * itemsize > target:
        tw = max(_LANES, ((target // (sub * itemsize)) // _LANES) * _LANES)
    else:
        tw = W

    unit = Lp if Lp > 1 else sub
    rows = max(1, target // max(tw * itemsize, 1))
    rows = max(unit, (rows // unit) * unit)
    if Lp > 1:
        # Row tile must stay a static multiple of the factor period Lp
        # (ragged last block is fine: block starts remain multiples of Lp).
        tr = min(rows, (R // Lp) * Lp)
    else:
        tr = R if rows >= R else rows

    grid = (pl.cdiv(R, tr), pl.cdiv(W, tw))
    f_rows = factor_flat.shape[0]

    y_flat = pl.pallas_call(
        _scale_kernel,
        out_shape=jax.ShapeDtypeStruct((R, W), x.dtype),
        grid_spec=pltpu.PrefetchScalarGridSpec(
            num_scalar_prefetch=0,
            grid=grid,
            in_specs=[
                pl.BlockSpec((tr, tw), lambda i, j: (i, j)),
                pl.BlockSpec((f_rows, tw), lambda i, j: (0, j)),
            ],
            out_specs=pl.BlockSpec((tr, tw), lambda i, j: (i, j)),
        ),
        compiler_params=pltpu.CompilerParams(
            dimension_semantics=("parallel", "parallel"),
            vmem_limit_bytes=vmem_limit,
        ),
    )(x_flat, factor_flat)

    y = y_flat.reshape(B, D) if lane_dense else y_flat
    return y, det


if __name__ == "__main__":
    key = jax.random.PRNGKey(0)

    def reference(x, scale, reverse):
        f = jnp.exp(scale) + EPS
        f = 1.0 / f if reverse else f
        return x * f, jnp.sum(scale)

    # (B, D, force_pallas): exercise every code path at small shapes.
    cases = [
        (8, 32, True),       # lane-dense, D | 128  (Lp == 1)
        (8, 32, False),      # tiny -> XLA short-circuit path
        (64, 48, True),      # lane-dense periodic slab (Lp = 24)
        (80, 48, True),      # periodic slab + ragged last row tile
        (16, 33, True),      # non-lane-dense fallback (full-width block)
        (2048, 256, False),  # > 1 MiB, regular row-streaming Pallas path
    ]

    results = []
    for idx, (batch, dim, force) in enumerate(cases):
        kx, ks = jax.random.split(jax.random.fold_in(key, idx))
        x = jax.random.normal(kx, (batch, dim), dtype=jnp.float32)
        scale = 0.1 * jax.random.normal(ks, (1, dim), dtype=jnp.float32)

        for reverse in (False, True):
            y, det = scaling_forward(x, scale, reverse=reverse,
                                     force_pallas=force)
            y_ref, det_ref = reference(x, scale, reverse)
            jax.block_until_ready((y, det))
            assert jnp.allclose(y, y_ref, rtol=1e-5, atol=1e-5), (
                f"value mismatch B={batch} D={dim} reverse={reverse}")
            assert jnp.allclose(det, det_ref, rtol=1e-5, atol=1e-5), (
                f"det mismatch B={batch} D={dim} reverse={reverse}")
            results.append((y, det))

    jax.block_until_ready(results)
    print("KERNEL_OK")
</pallas_src>

<mosaic_0001>
module attributes {stable_mosaic.version = 11 : i64} {
  func.func @_scale_kernel(%arg0: i32, %arg1: i32, %arg2: memref<2x128xf32, #tpu.memory_space<vmem>>, %arg3: memref<1x128xf32, #tpu.memory_space<vmem>>, %arg4: memref<2x128xf32, #tpu.memory_space<vmem>>) attributes {dimension_semantics = [#tpu.dimension_semantics<parallel>, #tpu.dimension_semantics<parallel>], iteration_bounds = array<i64: 1, 1>, scalar_prefetch = 0 : i64, scratch_operands = 0 : i64, tpu.core_type = #tpu.core_type<tc>, window_params = [{transform_indices = @transform_0, window_bounds = array<i64: 2, 128>}, {transform_indices = @transform_1, window_bounds = array<i64: 1, 128>}, {transform_indices = @transform_2, window_bounds = array<i64: 2, 128>}]} {
    %c0 = arith.constant 0 : index
    %c0_0 = arith.constant 0 : index
    %0 = vector.load %arg2[%c0, %c0_0] : memref<2x128xf32, #tpu.memory_space<vmem>>, vector<2x128xf32>
    %c0_1 = arith.constant 0 : index
    %c0_2 = arith.constant 0 : index
    %1 = vector.load %arg3[%c0_1, %c0_2] : memref<1x128xf32, #tpu.memory_space<vmem>>, vector<1x128xf32>
    %2 = vector.broadcast %1 : vector<1x128xf32> to vector<2x128xf32>
    %3 = arith.mulf %0, %2 : vector<2x128xf32>
    %c0_3 = arith.constant 0 : index
    %c0_4 = arith.constant 0 : index
    %4 = vector.load %arg4[%c0_3, %c0_4] : memref<2x128xf32, #tpu.memory_space<vmem>>, vector<2x128xf32>
    tpu.vector_store %arg4[%c0_3, %c0_4], %3 {strides = array<i32>} : memref<2x128xf32, #tpu.memory_space<vmem>>, vector<2x128xf32>,
    return
  }
  func.func @transform_0(%arg0: i32, %arg1: i32) -> (i32, i32) {
    %c0_i32 = arith.constant 0 : i32
    return %arg0, %arg1 : i32, i32
  }
  func.func @transform_1(%arg0: i32, %arg1: i32) -> (i32, i32) {
    %c0_i32 = arith.constant 0 : i32
    %c0_i32_0 = arith.constant 0 : i32
    return %c0_i32, %arg1 : i32, i32
  }
  func.func @transform_2(%arg0: i32, %arg1: i32) -> (i32, i32) {
    %c0_i32 = arith.constant 0 : i32
    return %arg0, %arg1 : i32, i32
  }
}

</mosaic_0001>

<bundles_post_ra>
// kernel: tpu_custom_call.1
= control target key start
LH: loop header
LB: loop body
LE: loop exit
PB: predicated region body
PF: predicated region fallthrough
CT: control target
= control target key end

     0   :  { %7 = vsyncpa [#allocation3], 0  ;;  %s122_s0 = inlined_call_operand.hbm [shape: f32[2,128], index: 0, kind: input, shape index: {}]   ;;  %s123_s1 = inlined_call_operand.vmem [shape: f32[1,128], index: 1, kind: input, shape index: {}]   ;;  %s124_s2 = inlined_call_operand.hbm [shape: f32[2,128], index: 2, kind: output, shape index: {}]  }
   0x1   :  { %8 = vsyncpa [#allocation4], 0  ;;  %s96_s9 = smov [#allocation2]  }
   0x2   :  { %s15_s10 = sshll.u32 %s96_s9, 4  ;;  %s16_s10 = int_to_ptr.vmem [resolvable:$true] %s15_s10 }
   0x3   :  { %s60_s11 = scalar_lea.vmem %s16_s10, 32  ;;  %p65_p1 = scmp.lt.s32.totalorder %s16_s10, %s16_s10 }
   0x4   :  { %p61_p0 = scmp.ne.s32.totalorder %s16_s10, %s60_s11  ;;  %p66_p2 = scmp.lt.s32.totalorder %s60_s11, %s60_s11 }
   0x6   :  { %p67_p3 = por %p66_p2, %p65_p1 }
   0x8   :  { %p68_p4 = pnand %p67_p3, %p61_p0 }
   0xa   :  { %71 = shalt.err (!%p68_p4)
}
   0xb   :  { %18 = dma.hbm_to_vmem [thread:$0]  %s122_s0, 32, %s16_s10, [#allocation3]  }
   0xc   :  { %92 = dma.done.wait [#allocation3], 32  }
   0xd   :  { %93 = vsyncadd [#allocation3], 4294967264  ;;  %s97_s14 = smov [#allocation5]   ;;  %v24_v0 = vld [vmem:[#allocation2] sm:$0x3] }
   0xe   :  { %s40_s15 = sshll.u32 %s97_s14, 4  ;;  %v49_v1 = vld [vmem:[%s123_s1] ss:$0 sm:$0xff]  ;;  %s41_s15 = int_to_ptr.vmem [resolvable:$true] %s40_s15 }
   0xf   :  { %v32_v2 = vmul.f32 %v49_v1, %v24_v0  ;;  %s72_s18 = scalar_lea.vmem %s41_s15, 32  ;;  %p77_p6 = scmp.lt.s32.totalorder %s41_s15, %s41_s15 }
  0x10   :  { %p73_p5 = scmp.ne.s32.totalorder %s41_s15, %s72_s18  ;;  %p78_p7 = scmp.lt.s32.totalorder %s72_s18, %s72_s18 }
  0x11   :  { %33 = vst [vmem:[#allocation5] sm:$0x3] %v32_v2 }
  0x12   :  { %p79_p8 = por %p78_p7, %p77_p6 }
  0x14   :  { %p80_p9 = pnand %p79_p8, %p73_p5 }
  0x16   :  { %83 = shalt.err (!%p80_p9)
}
  0x17   :  { %43 = dma.vmem_to_hbm [thread:$0]  %s41_s15, 32, %s124_s2, [#allocation4]  }
  0x18   :  { %94 = dma.done.wait [#allocation4], 32  }
  0x19   :  { %95 = vsyncadd [#allocation4], 4294967264 }
  0x1a   :  { %47 = vsyncpa [#allocation3], 1 }
  0x1b   :  { %48 = vsyncpa [#allocation4], 1 }

</bundles_post_ra>
